<compile_context>
chip_gen: v7x
topology: tpu7x:2x2x1
jax: 0.10.0
libtpu: 0.0.40
codegen_flags: <defaults>
</compile_context>

<pallas_src>
import math
import jax
import jax.numpy as jnp
from jax.experimental import pallas as pl
from jax.experimental.pallas import tpu as pltpu


def _vae_kernel(x_ref, eps_ref,
                w1_ref, b1_ref, w2_ref, b2_ref,
                w3_ref, b3_ref,                      # fused [H2p, 2*Lp] mu/logvar projection
                w4_ref, b4_ref, w5_ref, b5_ref, w6_ref, b6_ref,
                recon_ref, mu_ref, logvar_ref):
    Lp = mu_ref.shape[-1]

    def mm(act_f32, w_ref, b_ref):
        # bf16 operands on the MXU, f32 accumulation, f32 bias add on the VPU.
        return jnp.dot(act_f32.astype(jnp.bfloat16), w_ref[...],
                       preferred_element_type=jnp.float32) + b_ref[...]

    x = x_ref[...]

    # ---- encode ----
    h1 = jnp.maximum(mm(x, w1_ref, b1_ref), 0.0)
    h2 = jnp.maximum(mm(h1, w2_ref, b2_ref), 0.0)
    ml = mm(h2, w3_ref, b3_ref)                      # [TB, 2*Lp]
    mu = ml[:, :Lp]
    logvar = ml[:, Lp:]

    # ---- reparameterize ----
    std = jnp.exp(0.5 * logvar)
    z = mu + std * eps_ref[...]

    # ---- decode ----
    h3 = jnp.maximum(mm(z, w4_ref, b4_ref), 0.0)
    h4 = jnp.maximum(mm(h3, w5_ref, b5_ref), 0.0)
    logits = mm(h4, w6_ref, b6_ref)
    recon = pl.reciprocal(1.0 + jnp.exp(-logits), approx=True)   # sigmoid via EUP

    recon_ref[...] = recon
    mu_ref[...] = mu
    logvar_ref[...] = logvar


def _round_up(x, m):
    return ((x + m - 1) // m) * m


def vae_forward(x, eps, params):
    """x: [B, image_size] f32, eps: [B, latent] f32, params: dict of [in,out] w / [1,out] b."""
    B, D = x.shape
    L = eps.shape[1]
    H1 = params["w1"].shape[1]
    H2 = params["w2"].shape[1]

    # Lane-dense padded feature dims.
    Dp = _round_up(D, 128)
    H1p = _round_up(H1, 128)
    H2p = _round_up(H2, 128)
    Lp = _round_up(L, 128)

    # Batch tile: largest of {up to 512 rows} that tiles the padded batch.
    TB = min(512, _round_up(B, 8))
    Bp = _round_up(B, TB)

    xp = jnp.pad(x, ((0, Bp - B), (0, Dp - D)))
    epsp = jnp.pad(eps, ((0, Bp - B), (0, Lp - L)))

    def pw(w, rp, cp):  # zero-pad weight, cast to bf16 for the MXU
        return jnp.pad(w, ((0, rp - w.shape[0]), (0, cp - w.shape[1]))).astype(jnp.bfloat16)

    def pb(b, cp):      # zero-pad bias, keep f32
        return jnp.pad(b, ((0, 0), (0, cp - b.shape[1])))

    w1 = pw(params["w1"], Dp, H1p);  b1 = pb(params["b1"], H1p)
    w2 = pw(params["w2"], H1p, H2p); b2 = pb(params["b2"], H2p)
    # Fused mu/logvar projection: [H2p, 2*Lp].
    w3 = jnp.concatenate([pw(params["w31"], H2p, Lp), pw(params["w32"], H2p, Lp)], axis=1)
    b3 = jnp.concatenate([pb(params["b31"], Lp), pb(params["b32"], Lp)], axis=1)
    w4 = pw(params["w4"], Lp, H2p);  b4 = pb(params["b4"], H2p)
    w5 = pw(params["w5"], H2p, H1p); b5 = pb(params["b5"], H1p)
    w6 = pw(params["w6"], H1p, Dp);  b6 = pb(params["b6"], Dp)

    ordered = [w1, b1, w2, b2, w3, b3, w4, b4, w5, b5, w6, b6]

    def act_spec(feat):
        # Streamed over the batch grid axis.
        return pl.BlockSpec((TB, feat), lambda i: (i, 0))

    def resident_spec(shape):
        # Same block for every grid step -> stays VMEM-resident (no re-DMA).
        return pl.BlockSpec(shape, lambda i: (0, 0))

    in_specs = [act_spec(Dp), act_spec(Lp)] + [resident_spec(p.shape) for p in ordered]
    out_shapes = (
        jax.ShapeDtypeStruct((Bp, Dp), jnp.float32),   # reconstruction
        jax.ShapeDtypeStruct((Bp, Lp), jnp.float32),   # mu
        jax.ShapeDtypeStruct((Bp, Lp), jnp.float32),   # logvar
    )
    out_specs = (act_spec(Dp), act_spec(Lp), act_spec(Lp))

    recon_p, mu_p, logvar_p = pl.pallas_call(
        _vae_kernel,
        out_shape=out_shapes,
        grid=(Bp // TB,),
        in_specs=in_specs,
        out_specs=out_specs,
        compiler_params=pltpu.CompilerParams(
            dimension_semantics=("parallel",)),
    )(xp, epsp, *ordered)

    return recon_p[:B, :D], mu_p[:B, :L], logvar_p[:B, :L]


def init_vae_params(key, image_size, hidden_1, hidden_2, latent):
    """Deterministic init mimicking PyTorch nn.Linear (uniform +/- 1/sqrt(fan_in)).
    Weights stored as [in, out], biases as [1, out]."""
    layer_dims = {
        "1": (image_size, hidden_1),
        "2": (hidden_1, hidden_2),
        "31": (hidden_2, latent),
        "32": (hidden_2, latent),
        "4": (latent, hidden_2),
        "5": (hidden_2, hidden_1),
        "6": (hidden_1, image_size),
    }
    params = {}
    keys = jax.random.split(key, 2 * len(layer_dims))
    for i, (name, (fan_in, fan_out)) in enumerate(layer_dims.items()):
        bound = 1.0 / math.sqrt(fan_in)
        params[f"w{name}"] = jax.random.uniform(
            keys[2 * i], (fan_in, fan_out), jnp.float32, -bound, bound)
        params[f"b{name}"] = jax.random.uniform(
            keys[2 * i + 1], (1, fan_out), jnp.float32, -bound, bound)
    return params


if __name__ == "__main__":
    # Small shapes consistent with the module: NCHW input [2, 4, 4, 4] flattened
    # to image_size = 4*4*4 = 64, hidden_1 = 32, hidden_2 = 32, latent = 16.
    IMAGE_SIZE, H1, H2, LATENT = 64, 32, 32, 16

    key = jax.random.PRNGKey(0)
    k_params, k_x, k_eps = jax.random.split(key, 3)

    params = init_vae_params(k_params, IMAGE_SIZE, H1, H2, LATENT)

    x_nchw = jax.random.normal(k_x, (2, 4, 4, 4), dtype=jnp.float32)
    x = x_nchw.reshape(-1, IMAGE_SIZE)              # x.view(-1, image_size)
    eps = jax.random.normal(k_eps, (x.shape[0], LATENT), dtype=jnp.float32)

    recon, mu, logvar = jax.jit(vae_forward)(x, eps, params)
    jax.block_until_ready((recon, mu, logvar))

    assert recon.shape == (2, IMAGE_SIZE)
    assert mu.shape == (2, LATENT) and logvar.shape == (2, LATENT)
    assert bool(jnp.all(jnp.isfinite(recon))) and bool(jnp.all(recon >= 0.0)) and bool(jnp.all(recon <= 1.0))
    print("KERNEL_OK")
</pallas_src>

<mosaic_0001>
module attributes {stable_mosaic.version = 11 : i64} {
  func.func @_vae_kernel(%arg0: i32, %arg1: memref<8x128xf32, #tpu.memory_space<vmem>>, %arg2: memref<8x128xf32, #tpu.memory_space<vmem>>, %arg3: memref<128x128xbf16, #tpu.memory_space<vmem>>, %arg4: memref<1x128xf32, #tpu.memory_space<vmem>>, %arg5: memref<128x128xbf16, #tpu.memory_space<vmem>>, %arg6: memref<1x128xf32, #tpu.memory_space<vmem>>, %arg7: memref<128x256xbf16, #tpu.memory_space<vmem>>, %arg8: memref<1x256xf32, #tpu.memory_space<vmem>>, %arg9: memref<128x128xbf16, #tpu.memory_space<vmem>>, %arg10: memref<1x128xf32, #tpu.memory_space<vmem>>, %arg11: memref<128x128xbf16, #tpu.memory_space<vmem>>, %arg12: memref<1x128xf32, #tpu.memory_space<vmem>>, %arg13: memref<128x128xbf16, #tpu.memory_space<vmem>>, %arg14: memref<1x128xf32, #tpu.memory_space<vmem>>, %arg15: memref<8x128xf32, #tpu.memory_space<vmem>>, %arg16: memref<8x128xf32, #tpu.memory_space<vmem>>, %arg17: memref<8x128xf32, #tpu.memory_space<vmem>>) attributes {dimension_semantics = [#tpu.dimension_semantics<parallel>], iteration_bounds = array<i64: 1>, scalar_prefetch = 0 : i64, scratch_operands = 0 : i64, tpu.core_type = #tpu.core_type<tc>, window_params = [{transform_indices = @transform_0, window_bounds = array<i64: 8, 128>}, {transform_indices = @transform_1, window_bounds = array<i64: 8, 128>}, {pipeline_mode = #tpu.pipeline_mode<synchronous>, transform_indices = @transform_2, window_bounds = array<i64: 128, 128>}, {pipeline_mode = #tpu.pipeline_mode<synchronous>, transform_indices = @transform_3, window_bounds = array<i64: 1, 128>}, {pipeline_mode = #tpu.pipeline_mode<synchronous>, transform_indices = @transform_4, window_bounds = array<i64: 128, 128>}, {pipeline_mode = #tpu.pipeline_mode<synchronous>, transform_indices = @transform_5, window_bounds = array<i64: 1, 128>}, {pipeline_mode = #tpu.pipeline_mode<synchronous>, transform_indices = @transform_6, window_bounds = array<i64: 128, 256>}, {pipeline_mode = #tpu.pipeline_mode<synchronous>, transform_indices = @transform_7, window_bounds = array<i64: 1, 256>}, {pipeline_mode = #tpu.pipeline_mode<synchronous>, transform_indices = @transform_8, window_bounds = array<i64: 128, 128>}, {pipeline_mode = #tpu.pipeline_mode<synchronous>, transform_indices = @transform_9, window_bounds = array<i64: 1, 128>}, {pipeline_mode = #tpu.pipeline_mode<synchronous>, transform_indices = @transform_10, window_bounds = array<i64: 128, 128>}, {pipeline_mode = #tpu.pipeline_mode<synchronous>, transform_indices = @transform_11, window_bounds = array<i64: 1, 128>}, {pipeline_mode = #tpu.pipeline_mode<synchronous>, transform_indices = @transform_12, window_bounds = array<i64: 128, 128>}, {pipeline_mode = #tpu.pipeline_mode<synchronous>, transform_indices = @transform_13, window_bounds = array<i64: 1, 128>}, {transform_indices = @transform_14, window_bounds = array<i64: 8, 128>}, {transform_indices = @transform_15, window_bounds = array<i64: 8, 128>}, {transform_indices = @transform_16, window_bounds = array<i64: 8, 128>}]} {
    %c0 = arith.constant 0 : index
    %c0_0 = arith.constant 0 : index
    %0 = vector.load %arg1[%c0, %c0_0] : memref<8x128xf32, #tpu.memory_space<vmem>>, vector<8x128xf32>
    %1 = arith.truncf %0 : vector<8x128xf32> to vector<8x128xbf16>
    %c0_1 = arith.constant 0 : index
    %c0_2 = arith.constant 0 : index
    %2 = vector.load %arg3[%c0_1, %c0_2] : memref<128x128xbf16, #tpu.memory_space<vmem>>, vector<128x128xbf16>
    %cst = arith.constant dense<0.000000e+00> : vector<8x128xf32>
    %3 = tpu.matmul %1, %2, %cst {dimension_numbers = #tpu.dot_dimension_numbers<[1], [0], [0], [1], [0, 0, 1, 1], [], []>} : vector<8x128xbf16>, vector<128x128xbf16>, vector<8x128xf32> -> vector<8x128xf32>
    %c0_3 = arith.constant 0 : index
    %c0_4 = arith.constant 0 : index
    %4 = vector.load %arg4[%c0_3, %c0_4] : memref<1x128xf32, #tpu.memory_space<vmem>>, vector<1x128xf32>
    %5 = vector.broadcast %4 : vector<1x128xf32> to vector<8x128xf32>
    %6 = arith.addf %3, %5 : vector<8x128xf32>
    %cst_5 = arith.constant 0.000000e+00 : f32
    %7 = vector.broadcast %cst_5 : f32 to vector<8x128xf32>
    %8 = arith.maximumf %6, %7 : vector<8x128xf32>
    %9 = arith.truncf %8 : vector<8x128xf32> to vector<8x128xbf16>
    %c0_6 = arith.constant 0 : index
    %c0_7 = arith.constant 0 : index
    %10 = vector.load %arg5[%c0_6, %c0_7] : memref<128x128xbf16, #tpu.memory_space<vmem>>, vector<128x128xbf16>
    %cst_8 = arith.constant dense<0.000000e+00> : vector<8x128xf32>
    %11 = tpu.matmul %9, %10, %cst_8 {dimension_numbers = #tpu.dot_dimension_numbers<[1], [0], [0], [1], [0, 0, 1, 1], [], []>} : vector<8x128xbf16>, vector<128x128xbf16>, vector<8x128xf32> -> vector<8x128xf32>
    %c0_9 = arith.constant 0 : index
    %c0_10 = arith.constant 0 : index
    %12 = vector.load %arg6[%c0_9, %c0_10] : memref<1x128xf32, #tpu.memory_space<vmem>>, vector<1x128xf32>
    %13 = vector.broadcast %12 : vector<1x128xf32> to vector<8x128xf32>
    %14 = arith.addf %11, %13 : vector<8x128xf32>
    %cst_11 = arith.constant 0.000000e+00 : f32
    %15 = vector.broadcast %cst_11 : f32 to vector<8x128xf32>
    %16 = arith.maximumf %14, %15 : vector<8x128xf32>
    %17 = arith.truncf %16 : vector<8x128xf32> to vector<8x128xbf16>
    %c0_12 = arith.constant 0 : index
    %c0_13 = arith.constant 0 : index
    %18 = vector.load %arg7[%c0_12, %c0_13] : memref<128x256xbf16, #tpu.memory_space<vmem>>, vector<128x256xbf16>
    %cst_14 = arith.constant dense<0.000000e+00> : vector<8x256xf32>
    %19 = tpu.matmul %17, %18, %cst_14 {dimension_numbers = #tpu.dot_dimension_numbers<[1], [0], [0], [1], [0, 0, 1, 1], [], []>} : vector<8x128xbf16>, vector<128x256xbf16>, vector<8x256xf32> -> vector<8x256xf32>
    %c0_15 = arith.constant 0 : index
    %c0_16 = arith.constant 0 : index
    %20 = vector.load %arg8[%c0_15, %c0_16] : memref<1x256xf32, #tpu.memory_space<vmem>>, vector<1x256xf32>
    %21 = vector.broadcast %20 : vector<1x256xf32> to vector<8x256xf32>
    %22 = arith.addf %19, %21 : vector<8x256xf32>
    %23 = vector.extract_strided_slice %22 {offsets = [0, 0], sizes = [8, 128], strides = [1, 1]} : vector<8x256xf32> to vector<8x128xf32>
    %24 = vector.extract_strided_slice %22 {offsets = [0, 128], sizes = [8, 128], strides = [1, 1]} : vector<8x256xf32> to vector<8x128xf32>
    %cst_17 = arith.constant 5.000000e-01 : f32
    %25 = vector.broadcast %cst_17 : f32 to vector<8x128xf32>
    %26 = arith.mulf %25, %24 : vector<8x128xf32>
    %27 = math.exp %26 : vector<8x128xf32>
    %c0_18 = arith.constant 0 : index
    %c0_19 = arith.constant 0 : index
    %28 = vector.load %arg2[%c0_18, %c0_19] : memref<8x128xf32, #tpu.memory_space<vmem>>, vector<8x128xf32>
    %29 = arith.mulf %27, %28 : vector<8x128xf32>
    %30 = arith.addf %23, %29 : vector<8x128xf32>
    %31 = arith.truncf %30 : vector<8x128xf32> to vector<8x128xbf16>
    %c0_20 = arith.constant 0 : index
    %c0_21 = arith.constant 0 : index
    %32 = vector.load %arg9[%c0_20, %c0_21] : memref<128x128xbf16, #tpu.memory_space<vmem>>, vector<128x128xbf16>
    %cst_22 = arith.constant dense<0.000000e+00> : vector<8x128xf32>
    %33 = tpu.matmul %31, %32, %cst_22 {dimension_numbers = #tpu.dot_dimension_numbers<[1], [0], [0], [1], [0, 0, 1, 1], [], []>} : vector<8x128xbf16>, vector<128x128xbf16>, vector<8x128xf32> -> vector<8x128xf32>
    %c0_23 = arith.constant 0 : index
    %c0_24 = arith.constant 0 : index
    %34 = vector.load %arg10[%c0_23, %c0_24] : memref<1x128xf32, #tpu.memory_space<vmem>>, vector<1x128xf32>
    %35 = vector.broadcast %34 : vector<1x128xf32> to vector<8x128xf32>
    %36 = arith.addf %33, %35 : vector<8x128xf32>
    %cst_25 = arith.constant 0.000000e+00 : f32
    %37 = vector.broadcast %cst_25 : f32 to vector<8x128xf32>
    %38 = arith.maximumf %36, %37 : vector<8x128xf32>
    %39 = arith.truncf %38 : vector<8x128xf32> to vector<8x128xbf16>
    %c0_26 = arith.constant 0 : index
    %c0_27 = arith.constant 0 : index
    %40 = vector.load %arg11[%c0_26, %c0_27] : memref<128x128xbf16, #tpu.memory_space<vmem>>, vector<128x128xbf16>
    %cst_28 = arith.constant dense<0.000000e+00> : vector<8x128xf32>
    %41 = tpu.matmul %39, %40, %cst_28 {dimension_numbers = #tpu.dot_dimension_numbers<[1], [0], [0], [1], [0, 0, 1, 1], [], []>} : vector<8x128xbf16>, vector<128x128xbf16>, vector<8x128xf32> -> vector<8x128xf32>
    %c0_29 = arith.constant 0 : index
    %c0_30 = arith.constant 0 : index
    %42 = vector.load %arg12[%c0_29, %c0_30] : memref<1x128xf32, #tpu.memory_space<vmem>>, vector<1x128xf32>
    %43 = vector.broadcast %42 : vector<1x128xf32> to vector<8x128xf32>
    %44 = arith.addf %41, %43 : vector<8x128xf32>
    %cst_31 = arith.constant 0.000000e+00 : f32
    %45 = vector.broadcast %cst_31 : f32 to vector<8x128xf32>
    %46 = arith.maximumf %44, %45 : vector<8x128xf32>
    %47 = arith.truncf %46 : vector<8x128xf32> to vector<8x128xbf16>
    %c0_32 = arith.constant 0 : index
    %c0_33 = arith.constant 0 : index
    %48 = vector.load %arg13[%c0_32, %c0_33] : memref<128x128xbf16, #tpu.memory_space<vmem>>, vector<128x128xbf16>
    %cst_34 = arith.constant dense<0.000000e+00> : vector<8x128xf32>
    %49 = tpu.matmul %47, %48, %cst_34 {dimension_numbers = #tpu.dot_dimension_numbers<[1], [0], [0], [1], [0, 0, 1, 1], [], []>} : vector<8x128xbf16>, vector<128x128xbf16>, vector<8x128xf32> -> vector<8x128xf32>
    %c0_35 = arith.constant 0 : index
    %c0_36 = arith.constant 0 : index
    %50 = vector.load %arg14[%c0_35, %c0_36] : memref<1x128xf32, #tpu.memory_space<vmem>>, vector<1x128xf32>
    %51 = vector.broadcast %50 : vector<1x128xf32> to vector<8x128xf32>
    %52 = arith.addf %49, %51 : vector<8x128xf32>
    %cst_37 = arith.constant 0.000000e+00 : f32
    %53 = vector.broadcast %cst_37 : f32 to vector<8x128xf32>
    %54 = arith.subf %53, %52 : vector<8x128xf32>
    %55 = math.exp %54 : vector<8x128xf32>
    %cst_38 = arith.constant 1.000000e+00 : f32
    %56 = vector.broadcast %cst_38 : f32 to vector<8x128xf32>
    %57 = arith.addf %56, %55 : vector<8x128xf32>
    %58 = tpu.reciprocal %57 {approx = true} : vector<8x128xf32> -> vector<8x128xf32>
    %c0_39 = arith.constant 0 : index
    %c0_40 = arith.constant 0 : index
    %59 = vector.load %arg15[%c0_39, %c0_40] : memref<8x128xf32, #tpu.memory_space<vmem>>, vector<8x128xf32>
    tpu.vector_store %arg15[%c0_39, %c0_40], %58 {strides = array<i32>} : memref<8x128xf32, #tpu.memory_space<vmem>>, vector<8x128xf32>,
    %c0_41 = arith.constant 0 : index
    %c0_42 = arith.constant 0 : index
    %60 = vector.load %arg16[%c0_41, %c0_42] : memref<8x128xf32, #tpu.memory_space<vmem>>, vector<8x128xf32>
    tpu.vector_store %arg16[%c0_41, %c0_42], %23 {strides = array<i32>} : memref<8x128xf32, #tpu.memory_space<vmem>>, vector<8x128xf32>,
    %c0_43 = arith.constant 0 : index
    %c0_44 = arith.constant 0 : index
    %61 = vector.load %arg17[%c0_43, %c0_44] : memref<8x128xf32, #tpu.memory_space<vmem>>, vector<8x128xf32>
    tpu.vector_store %arg17[%c0_43, %c0_44], %24 {strides = array<i32>} : memref<8x128xf32, #tpu.memory_space<vmem>>, vector<8x128xf32>,
    return
  }
  func.func @transform_0(%arg0: i32) -> (i32, i32) {
    %c0_i32 = arith.constant 0 : i32
    %c0_i32_0 = arith.constant 0 : i32
    return %arg0, %c0_i32 : i32, i32
  }
  func.func @transform_1(%arg0: i32) -> (i32, i32) {
    %c0_i32 = arith.constant 0 : i32
    %c0_i32_0 = arith.constant 0 : i32
    return %arg0, %c0_i32 : i32, i32
  }
  func.func @transform_2(%arg0: i32) -> (i32, i32) {
    %c0_i32 = arith.constant 0 : i32
    %c0_i32_0 = arith.constant 0 : i32
    %c0_i32_1 = arith.constant 0 : i32
    return %c0_i32, %c0_i32_0 : i32, i32
  }
  func.func @transform_3(%arg0: i32) -> (i32, i32) {
    %c0_i32 = arith.constant 0 : i32
    %c0_i32_0 = arith.constant 0 : i32
    %c0_i32_1 = arith.constant 0 : i32
    return %c0_i32, %c0_i32_0 : i32, i32
  }
  func.func @transform_4(%arg0: i32) -> (i32, i32) {
    %c0_i32 = arith.constant 0 : i32
    %c0_i32_0 = arith.constant 0 : i32
    %c0_i32_1 = arith.constant 0 : i32
    return %c0_i32, %c0_i32_0 : i32, i32
  }
  func.func @transform_5(%arg0: i32) -> (i32, i32) {
    %c0_i32 = arith.constant 0 : i32
    %c0_i32_0 = arith.constant 0 : i32
    %c0_i32_1 = arith.constant 0 : i32
    return %c0_i32, %c0_i32_0 : i32, i32
  }
  func.func @transform_6(%arg0: i32) -> (i32, i32) {
    %c0_i32 = arith.constant 0 : i32
    %c0_i32_0 = arith.constant 0 : i32
    %c0_i32_1 = arith.constant 0 : i32
    return %c0_i32, %c0_i32_0 : i32, i32
  }
  func.func @transform_7(%arg0: i32) -> (i32, i32) {
    %c0_i32 = arith.constant 0 : i32
    %c0_i32_0 = arith.constant 0 : i32
    %c0_i32_1 = arith.constant 0 : i32
    return %c0_i32, %c0_i32_0 : i32, i32
  }
  func.func @transform_8(%arg0: i32) -> (i32, i32) {
    %c0_i32 = arith.constant 0 : i32
    %c0_i32_0 = arith.constant 0 : i32
    %c0_i32_1 = arith.constant 0 : i32
    return %c0_i32, %c0_i32_0 : i32, i32
  }
  func.func @transform_9(%arg0: i32) -> (i32, i32) {
    %c0_i32 = arith.constant 0 : i32
    %c0_i32_0 = arith.constant 0 : i32
    %c0_i32_1 = arith.constant 0 : i32
    return %c0_i32, %c0_i32_0 : i32, i32
  }
  func.func @transform_10(%arg0: i32) -> (i32, i32) {
    %c0_i32 = arith.constant 0 : i32
    %c0_i32_0 = arith.constant 0 : i32
    %c0_i32_1 = arith.constant 0 : i32
    return %c0_i32, %c0_i32_0 : i32, i32
  }
  func.func @transform_11(%arg0: i32) -> (i32, i32) {
    %c0_i32 = arith.constant 0 : i32
    %c0_i32_0 = arith.constant 0 : i32
    %c0_i32_1 = arith.constant 0 : i32
    return %c0_i32, %c0_i32_0 : i32, i32
  }
  func.func @transform_12(%arg0: i32) -> (i32, i32) {
    %c0_i32 = arith.constant 0 : i32
    %c0_i32_0 = arith.constant 0 : i32
    %c0_i32_1 = arith.constant 0 : i32
    return %c0_i32, %c0_i32_0 : i32, i32
  }
  func.func @transform_13(%arg0: i32) -> (i32, i32) {
    %c0_i32 = arith.constant 0 : i32
    %c0_i32_0 = arith.constant 0 : i32
    %c0_i32_1 = arith.constant 0 : i32
    return %c0_i32, %c0_i32_0 : i32, i32
  }
  func.func @transform_14(%arg0: i32) -> (i32, i32) {
    %c0_i32 = arith.constant 0 : i32
    %c0_i32_0 = arith.constant 0 : i32
    return %arg0, %c0_i32 : i32, i32
  }
  func.func @transform_15(%arg0: i32) -> (i32, i32) {
    %c0_i32 = arith.constant 0 : i32
    %c0_i32_0 = arith.constant 0 : i32
    return %arg0, %c0_i32 : i32, i32
  }
  func.func @transform_16(%arg0: i32) -> (i32, i32) {
    %c0_i32 = arith.constant 0 : i32
    %c0_i32_0 = arith.constant 0 : i32
    return %arg0, %c0_i32 : i32, i32
  }
}

</mosaic_0001>

<bundles_post_ra>
// kernel: vae_forward.1
= control target key start
LH: loop header
LB: loop body
LE: loop exit
PB: predicated region body
PF: predicated region fallthrough
CT: control target
= control target key end

     0   :  { %v1071_v0 = vmov 0.0   ;;  %vm1072_vm0 = vmmov 0   ;;  %v1073_v43 = vmov 0   ;;  %s1410_s2 = inlined_call_operand.vmem [shape: bf16[128,128], index: 2, kind: input, shape index: {}]   ;;  %s1411_s4 = inlined_call_operand.vmem [shape: bf16[128,128], index: 4, kind: input, shape index: {}]   ;;  %s1412_s0 = inlined_call_operand.vmem [shape: f32[8,128], index: 0, kind: input, shape index: {}]   ;;  %s1413_s6 = inlined_call_operand.vmem [shape: bf16[128,256], index: 6, kind: input, shape index: {}]   ;;  %s1414_s3 = inlined_call_operand.vmem [shape: f32[1,128], index: 3, kind: input, shape index: {}]   ;;  %s1415_s8 = inlined_call_operand.vmem [shape: bf16[128,128], index: 8, kind: input, shape index: {}]   ;;  %s1416_s5 = inlined_call_operand.vmem [shape: f32[1,128], index: 5, kind: input, shape index: {}]   ;;  %s1417_s10 = inlined_call_operand.vmem [shape: bf16[128,128], index: 10, kind: input, shape index: {}]   ;;  %s1418_s7 = inlined_call_operand.vmem [shape: f32[1,256], index: 7, kind: input, shape index: {}]   ;;  %s1419_s15 = inlined_call_operand.vmem [shape: f32[8,128], index: 15, kind: output, shape index: {1}]   ;;  %s1420_s16 = inlined_call_operand.vmem [shape: f32[8,128], index: 16, kind: output, shape index: {2}]   ;;  %s1421_s1 = inlined_call_operand.vmem [shape: f32[8,128], index: 1, kind: input, shape index: {}]   ;;  %s1422_s12 = inlined_call_operand.vmem [shape: bf16[128,128], index: 12, kind: input, shape index: {}]   ;;  %s1423_s9 = inlined_call_operand.vmem [shape: f32[1,128], index: 9, kind: input, shape index: {}]   ;;  %s1424_s11 = inlined_call_operand.vmem [shape: f32[1,128], index: 11, kind: input, shape index: {}]   ;;  %s1425_s13 = inlined_call_operand.vmem [shape: f32[1,128], index: 13, kind: input, shape index: {}]   ;;  %s1426_s14 = inlined_call_operand.vmem [shape: f32[8,128], index: 14, kind: output, shape index: {0}]  }
   0x1   :  { %1428 = sst [smem:[#allocation2_spill]] %s1410_s2  ;;  %898 = vmatprep.subr.bf16.mxu0 %v1071_v0  ;;  %914 = vmatprep.mubr.msk.bf16.mxu0 %vm1072_vm0, %v1071_v0  ;;  %v1009_v4 = vld [vmem:[%s1411_s4] sm:$0xff]   ;;  %v1010_v6 = vld [vmem:[%s1411_s4 + $0x8] sm:$0xff]   ;;  %v1011_v8 = vld [vmem:[%s1411_s4 + $0x10] sm:$0xff]  }
   0x2   :  { %s1429_s23 = sld [smem:[#allocation2_spill]]  ;;  %918 = vmatprep.subr.bf16.mxu1 %v1071_v0  ;;  %934 = vmatprep.mubr.msk.bf16.mxu1 %vm1072_vm0, %v1071_v0  ;;  %v1012_v10 = vld [vmem:[%s1411_s4 + $0x18] sm:$0xff]   ;;  %v1013_v12 = vld [vmem:[%s1411_s4 + $0x20] sm:$0xff]   ;;  %v1014_v15 = vld [vmem:[%s1411_s4 + $0x28] sm:$0xff]  }
   0x3   :  { %919 = vmatpush3.bf16.msra.mxu1 %v1009_v4  ;;  %v51_v14 = vld [vmem:[%s1412_s0] sm:$0xff]  ;;  %v1015_v17 = vld [vmem:[%s1411_s4 + $0x30] sm:$0xff]   ;;  %v1016_v18 = vld [vmem:[%s1411_s4 + $0x38] sm:$0xff]  }
   0x4   :  { %920 = vmatprep.subr.bf16.mxu1 %v1071_v0  ;;  %v52_v16 = vpack.c.bf16 %v51_v14, %v51_v14  ;;  %v1017_v19 = vld [vmem:[%s1413_s6] ss:$8 sps:$4 sm:$0xff]   ;;  %v1019_v20 = vld [vmem:[%s1413_s6 + $0x4] ss:$8 sps:$4 sm:$0xff]   ;;  %v1022_v21 = vld [vmem:[%s1413_s6 + $0x14] ss:$8 sps:$4 sm:$0xff]  }
   0x5   :  { %v1020_v22 = vld [vmem:[%s1413_s6 + $0x10] ss:$8 sps:$4 sm:$0xff]   ;;  %v1025_v23 = vld [vmem:[%s1413_s6 + $0x24] ss:$8 sps:$4 sm:$0xff]   ;;  %v1023_v24 = vld [vmem:[%s1413_s6 + $0x20] ss:$8 sps:$4 sm:$0xff]  }
   0x6   :  { %v1028_v25 = vld [vmem:[%s1413_s6 + $0x34] ss:$8 sps:$4 sm:$0xff]   ;;  %v1026_v26 = vld [vmem:[%s1413_s6 + $0x30] ss:$8 sps:$4 sm:$0xff]   ;;  %v1031_v27 = vld [vmem:[%s1413_s6 + $0x44] ss:$8 sps:$4 sm:$0xff]  }
   0x7   :  { %921 = vmatpush3.bf16.msra.mxu1 %v1010_v6  ;;  %v1029_v28 = vld [vmem:[%s1413_s6 + $0x40] ss:$8 sps:$4 sm:$0xff]   ;;  %v1034_v29 = vld [vmem:[%s1413_s6 + $0x54] ss:$8 sps:$4 sm:$0xff]   ;;  %v1032_v30 = vld [vmem:[%s1413_s6 + $0x50] ss:$8 sps:$4 sm:$0xff]  }
   0x8   :  { %v1001_v1 = vld [vmem:[%s1429_s23] sm:$0xff]   ;;  %v1002_v2 = vld [vmem:[%s1429_s23 + $0x8] sm:$0xff]   ;;  %v1003_v3 = vld [vmem:[%s1429_s23 + $0x10] sm:$0xff]   ;;  %922 = vmatprep.subr.bf16.mxu1 %v1071_v0 }
   0x9   :  { %899 = vmatpush3.bf16.msra.mxu0 %v1001_v1  ;;  %v1004_v5 = vld [vmem:[%s1429_s23 + $0x18] sm:$0xff]   ;;  %v1005_v7 = vld [vmem:[%s1429_s23 + $0x20] sm:$0xff]   ;;  %v1006_v9 = vld [vmem:[%s1429_s23 + $0x28] sm:$0xff]  }
   0xa   :  { %900 = vmatprep.subr.bf16.mxu0 %v1071_v0  ;;  %v1007_v11 = vld [vmem:[%s1429_s23 + $0x30] sm:$0xff]   ;;  %v1008_v13 = vld [vmem:[%s1429_s23 + $0x38] sm:$0xff]   ;;  %v1037_v31 = vld [vmem:[%s1413_s6 + $0x64] ss:$8 sps:$4 sm:$0xff]  }
   0xb   :  { %923 = vmatpush3.bf16.msra.mxu1 %v1011_v8  ;;  %v1035_v32 = vld [vmem:[%s1413_s6 + $0x60] ss:$8 sps:$4 sm:$0xff]   ;;  %v1040_v41 = vld [vmem:[%s1413_s6 + $0x74] ss:$8 sps:$4 sm:$0xff]   ;;  %v1038_v42 = vld [vmem:[%s1413_s6 + $0x70] ss:$8 sps:$4 sm:$0xff]  }
   0xc   :  { %924 = vmatprep.subr.bf16.mxu1 %v1071_v0  ;;  %v792_v33 = vld [vmem:[%s1414_s3] ss:$0 sm:$0xff]  ;;  %v1042_v45 = vld [vmem:[%s1415_s8 + $0x8] sm:$0xff]   ;;  %v1043_v54 = vld [vmem:[%s1415_s8 + $0x10] sm:$0xff]  }
   0xd   :  { %901 = vmatpush3.bf16.msra.mxu0 %v1002_v2  ;;  %v1041_v44 = vld [vmem:[%s1415_s8] sm:$0xff]   ;;  %v1044_v55 = vld [vmem:[%s1415_s8 + $0x18] sm:$0xff]   ;;  %v1046_v57 = vld [vmem:[%s1415_s8 + $0x28] sm:$0xff]  }
   0xe   :  { %902 = vmatprep.subr.bf16.mxu0 %v1071_v0  ;;  %v801_v46 = vld [vmem:[%s1416_s5] ss:$0 sm:$0xff]  ;;  %v1047_v58 = vld [vmem:[%s1415_s8 + $0x30] sm:$0xff]   ;;  %v1048_v59 = vld [vmem:[%s1415_s8 + $0x38] sm:$0xff]  }
   0xf   :  { %925 = vmatpush3.bf16.msra.mxu1 %v1012_v10  ;;  %v1045_v56 = vld [vmem:[%s1415_s8 + $0x20] sm:$0xff]   ;;  %v1050_v61 = vld [vmem:[%s1417_s10 + $0x8] sm:$0xff]   ;;  %v1051_v62 = vld [vmem:[%s1417_s10 + $0x10] sm:$0xff]  }
  0x10   :  { %926 = vmatprep.subr.bf16.mxu1 %v1071_v0  ;;  %v1049_v60 = vld [vmem:[%s1417_s10] sm:$0xff]   ;;  %v1052_v63 = vld [vmem:[%s1417_s10 + $0x18] sm:$0xff]   ;;  %v1054_v2 = vld [vmem:[%s1417_s10 + $0x28] sm:$0xff]  }
  0x11   :  { %903 = vmatpush3.bf16.msra.mxu0 %v1003_v3  ;;  %v1053_v1 = vld [vmem:[%s1417_s10 + $0x20] sm:$0xff]   ;;  %v297_v3 = vlaneseq }
  0x12   :  { %904 = vmatprep.subr.bf16.mxu0 %v1071_v0  ;;  %v295_v6 = vld [vmem:[%s1418_s7] sm:$0x3] }
  0x13   :  { %927 = vmatpush3.bf16.msra.mxu1 %v1013_v12  ;;  %v298_v4 = vshrl.u32 %v297_v3, 7 }
  0x14   :  { %928 = vmatprep.subr.bf16.mxu1 %v1071_v0 }
  0x15   :  { %905 = vmatpush3.bf16.msra.mxu0 %v1004_v5  ;;  %v299_v5 = vsub.s32 0, %v298_v4 }
  0x16   :  { %906 = vmatprep.subr.bf16.mxu0 %v1071_v0 }
  0x17   :  { %929 = vmatpush3.bf16.msra.mxu1 %v1014_v15  ;;  %v300_v8 = vrot.slane %v295_v6, %v299_v5 }
  0x18   :  { %930 = vmatprep.subr.bf16.mxu1 %v1071_v0 }
  0x19   :  { %907 = vmatpush3.bf16.msra.mxu0 %v1005_v7  ;;  %v303_v7 = vsub.s32 1, %v298_v4 }
  0x1a   :  { %908 = vmatprep.subr.bf16.mxu0 %v1071_v0 }
  0x1b   :  { %931 = vmatpush3.bf16.msra.mxu1 %v1015_v17 }
  0x1c   :  { %932 = vmatprep.subr.bf16.mxu1 %v1071_v0 }
  0x1d   :  { %909 = vmatpush3.bf16.msra.mxu0 %v1006_v9  ;;  %v304_v9 = vrot.slane %v295_v6, %v303_v7 }
  0x1e   :  { %910 = vmatprep.subr.bf16.mxu0 %v1071_v0 }
  0x1f   :  { %933 = vmatpush3.bf16.msra.mxu1 %v1016_v18  ;;  %v431_v18 = vld [vmem:[%s1421_s1] sm:$0xff] }
  0x20   :  { %938 = vmatprep.subr.bf16.mxu1 %v1071_v0 }
  0x21   :  { %911 = vmatpush3.bf16.msra.mxu0 %v1007_v11 }
  0x22   :  { %912 = vmatprep.subr.bf16.mxu0 %v1071_v0 }
  0x25   :  { %913 = vmatpush3.bf16.msra.mxu0 %v1008_v13 }
  0x26   :  { %387 = vmatprep.subr.bf16.mxu0 %v1019_v20 }
  0x28   :  { %915 = vmatmul.mubr.bf16.vlgmr.msra.gmra.mrb[0].mxu0 %v52_v16 }
  0x29   :  { %388 = vmatpush1.bf16.msra.mxu0 %v1017_v19  ;;  %419 = vmatprep.mubr.bf16.mxu0 %v1073_v43 }
  0x2a   :  { %389 = vmatprep.subr.bf16.mxu0 %v1022_v21 }
  0x2d   :  { %390 = vmatpush1.bf16.msra.mxu0 %v1020_v22 }
  0x2e   :  { %391 = vmatprep.subr.bf16.mxu0 %v1025_v23  ;;  %v1055_v23 = vld [vmem:[%s1417_s10 + $0x30] sm:$0xff]  }
  0x31   :  { %392 = vmatpush1.bf16.msra.mxu0 %v1023_v24  ;;  %v1056_v24 = vld [vmem:[%s1417_s10 + $0x38] sm:$0xff]  }
  0x32   :  { %393 = vmatprep.subr.bf16.mxu0 %v1028_v25  ;;  %v1057_v25 = vld [vmem:[%s1422_s12] sm:$0xff]  }
  0x35   :  { %394 = vmatpush1.bf16.msra.mxu0 %v1026_v26  ;;  %v1058_v26 = vld [vmem:[%s1422_s12 + $0x8] sm:$0xff]  }
  0x36   :  { %395 = vmatprep.subr.bf16.mxu0 %v1031_v27  ;;  %v1059_v27 = vld [vmem:[%s1422_s12 + $0x10] sm:$0xff]  }
  0x39   :  { %396 = vmatpush1.bf16.msra.mxu0 %v1029_v28  ;;  %v1060_v28 = vld [vmem:[%s1422_s12 + $0x18] sm:$0xff]  }
  0x3a   :  { %397 = vmatprep.subr.bf16.mxu0 %v1034_v29  ;;  %v1061_v29 = vld [vmem:[%s1422_s12 + $0x20] sm:$0xff]  }
  0x3d   :  { %398 = vmatpush1.bf16.msra.mxu0 %v1032_v30  ;;  %v1062_v30 = vld [vmem:[%s1422_s12 + $0x28] sm:$0xff]  }
  0x3e   :  { %399 = vmatprep.subr.bf16.mxu0 %v1037_v31  ;;  %v826_v31 = vld [vmem:[%s1423_s9] ss:$0 sm:$0xff] }
  0x41   :  { %400 = vmatpush1.bf16.msra.mxu0 %v1035_v32 }
  0x42   :  { %401 = vmatprep.subr.bf16.mxu0 %v1040_v41  ;;  %v835_v41 = vld [vmem:[%s1424_s11] ss:$0 sm:$0xff] }
  0x45   :  { %402 = vmatpush1.bf16.msra.mxu0 %v1038_v42 }
  0x46   :  { %958 = vmatprep.subr.bf16.mxu0 %v1071_v0 }
  0xfb   :  { %v158_v34 = vpop.f32.mrb[0].mxu0 }
  0xfc   :  { %v159_v35 = vadd.f32 %v792_v33, %v158_v34  ;;  %v916_v36 = vpop.f32.mrb[1].mxu0 }
  0xfd   :  { %v161_v37 = vpop.f32.mrb[2].mxu0 }
  0xfe   :  { %v164_v38 = vmax.f32 %v159_v35, 0.0  ;;  %v917_v39 = vpop.f32.mrb[3].mxu0 }
  0xff   :  { %v1063_v39 = vld [vmem:[%s1422_s12 + $0x30] sm:$0xff]  }
 0x100   :  { %v165_v40 = vpack.c.bf16 %v164_v38, %v164_v38 }
 0x102   :  { %935 = vmatmul.mubr.bf16.vlgmr.msra.gmra.mrb[0].mxu1 %v165_v40  ;;  %v1064_v40 = vld [vmem:[%s1422_s12 + $0x38] sm:$0xff]  }
 0x103   :  { %954 = vmatprep.mubr.msk.bf16.mxu1 %vm1072_vm0, %v1071_v0  ;;  %939 = vmatpush3.bf16.msra.mxu1 %v1041_v44 }
 0x104   :  { %940 = vmatprep.subr.bf16.mxu1 %v1071_v0 }
 0x107   :  { %941 = vmatpush3.bf16.msra.mxu1 %v1042_v45 }
 0x108   :  { %942 = vmatprep.subr.bf16.mxu1 %v1071_v0 }
 0x10b   :  { %943 = vmatpush3.bf16.msra.mxu1 %v1043_v54 }
 0x10c   :  { %944 = vmatprep.subr.bf16.mxu1 %v1071_v0 }
 0x10f   :  { %945 = vmatpush3.bf16.msra.mxu1 %v1044_v55 }
 0x110   :  { %946 = vmatprep.subr.bf16.mxu1 %v1071_v0 }
 0x113   :  { %947 = vmatpush3.bf16.msra.mxu1 %v1045_v56 }
 0x114   :  { %948 = vmatprep.subr.bf16.mxu1 %v1071_v0 }
 0x117   :  { %949 = vmatpush3.bf16.msra.mxu1 %v1046_v57 }
 0x118   :  { %950 = vmatprep.subr.bf16.mxu1 %v1071_v0 }
 0x11b   :  { %951 = vmatpush3.bf16.msra.mxu1 %v1047_v58 }
 0x11c   :  { %952 = vmatprep.subr.bf16.mxu1 %v1071_v0 }
 0x11f   :  { %953 = vmatpush3.bf16.msra.mxu1 %v1048_v59 }
 0x120   :  { %978 = vmatprep.subr.bf16.mxu1 %v1071_v0 }
 0x1d5   :  { %v271_v47 = vpop.f32.mrb[0].mxu1 }
 0x1d6   :  { %v272_v48 = vadd.f32 %v801_v46, %v271_v47  ;;  %v936_v49 = vpop.f32.mrb[1].mxu1 }
 0x1d7   :  { %v274_v50 = vpop.f32.mrb[2].mxu1 }
 0x1d8   :  { %v277_v51 = vmax.f32 %v272_v48, 0.0  ;;  %v937_v52 = vpop.f32.mrb[3].mxu1 }
 0x1da   :  { %v278_v53 = vpack.c.bf16 %v277_v51, %v277_v51 }
 0x1dc   :  { %420 = vmatmul.mubr.bf16.vlgmr.msra.gmra.mrb[4].mxu0 %v278_v53 }
 0x1dd   :  { %974 = vmatprep.mubr.msk.bf16.mxu0 %vm1072_vm0, %v1071_v0  ;;  %959 = vmatpush3.bf16.msra.mxu0 %v1049_v60 }
 0x1de   :  { %960 = vmatprep.subr.bf16.mxu0 %v1071_v0 }
 0x1e1   :  { %961 = vmatpush3.bf16.msra.mxu0 %v1050_v61 }
 0x1e2   :  { %962 = vmatprep.subr.bf16.mxu0 %v1071_v0 }
 0x1e5   :  { %963 = vmatpush3.bf16.msra.mxu0 %v1051_v62 }
 0x1e6   :  { %964 = vmatprep.subr.bf16.mxu0 %v1071_v0 }
 0x1e9   :  { %965 = vmatpush3.bf16.msra.mxu0 %v1052_v63 }
 0x1ea   :  { %966 = vmatprep.subr.bf16.mxu0 %v1071_v0 }
 0x1ed   :  { %967 = vmatpush3.bf16.msra.mxu0 %v1053_v1 }
 0x1ee   :  { %968 = vmatprep.subr.bf16.mxu0 %v1071_v0 }
 0x1f1   :  { %969 = vmatpush3.bf16.msra.mxu0 %v1054_v2 }
 0x1f2   :  { %970 = vmatprep.subr.bf16.mxu0 %v1071_v0 }
 0x1f5   :  { %971 = vmatpush3.bf16.msra.mxu0 %v1055_v23 }
 0x1f6   :  { %972 = vmatprep.subr.bf16.mxu0 %v1071_v0 }
 0x1f9   :  { %973 = vmatpush3.bf16.msra.mxu0 %v1056_v24 }
 0x2af   :  { %v421_v10 = vpop.f32.mrb[4].mxu0 }
 0x2b0   :  { %v422_v11 = vadd.f32 %v421_v10, %v300_v8  ;;  %v423_v12 = vpop.f32.mrb[5].mxu0 }
 0x2b1   :  { %v424_v13 = vadd.f32 %v423_v12, %v304_v9  ;;  %v425_v14 = vpop.f32.mrb[6].mxu0 }
 0x2b2   :  { %778 = vst [vmem:[%s1419_s15] sm:$0xff] %v422_v11  ;;  %v426_v15 = vpop.f32.mrb[7].mxu0 }
 0x2b3   :  { %v428_v16 = vmul.f32 0.5, %v424_v13  ;;  %779 = vst [vmem:[%s1420_s16] sm:$0xff] %v424_v13 }
 0x2b5   :  { %v429_v17 = vmul.f32 1.442695, %v428_v16 }
 0x2b7   :  { %1065 = vpow2.f32 %v429_v17 }
 0x2c1   :  { %v1066_v19 = vpop.eup %1065 }
 0x2c2   :  { %v432_v20 = vmul.f32 %v1066_v19, %v431_v18 }
 0x2c4   :  { %v433_v21 = vadd.f32 %v432_v20, %v422_v11 }
 0x2c6   :  { %v434_v22 = vpack.c.bf16 %v433_v21, %v433_v21 }
 0x2c8   :  { %955 = vmatmul.mubr.bf16.vlgmr.msra.gmra.mrb[4].mxu1 %v434_v22 }
 0x2c9   :  { %994 = vmatprep.mubr.msk.bf16.mxu1 %vm1072_vm0, %v1071_v0  ;;  %979 = vmatpush3.bf16.msra.mxu1 %v1057_v25 }
 0x2ca   :  { %980 = vmatprep.subr.bf16.mxu1 %v1071_v0 }
 0x2cd   :  { %981 = vmatpush3.bf16.msra.mxu1 %v1058_v26 }
 0x2ce   :  { %982 = vmatprep.subr.bf16.mxu1 %v1071_v0 }
 0x2d1   :  { %983 = vmatpush3.bf16.msra.mxu1 %v1059_v27 }
 0x2d2   :  { %984 = vmatprep.subr.bf16.mxu1 %v1071_v0 }
 0x2d5   :  { %985 = vmatpush3.bf16.msra.mxu1 %v1060_v28 }
 0x2d6   :  { %986 = vmatprep.subr.bf16.mxu1 %v1071_v0 }
 0x2d9   :  { %987 = vmatpush3.bf16.msra.mxu1 %v1061_v29 }
 0x2da   :  { %988 = vmatprep.subr.bf16.mxu1 %v1071_v0 }
 0x2dd   :  { %989 = vmatpush3.bf16.msra.mxu1 %v1062_v30 }
 0x2de   :  { %990 = vmatprep.subr.bf16.mxu1 %v1071_v0 }
 0x2e1   :  { %991 = vmatpush3.bf16.msra.mxu1 %v1063_v39 }
 0x2e2   :  { %992 = vmatprep.subr.bf16.mxu1 %v1071_v0  ;;  %v844_v0 = vld [vmem:[%s1425_s13] ss:$0 sm:$0xff] }
 0x2e5   :  { %993 = vmatpush3.bf16.msra.mxu1 %v1064_v40 }
 0x39b   :  { %v540_v32 = vpop.f32.mrb[4].mxu1 }
 0x39c   :  { %v541_v33 = vadd.f32 %v826_v31, %v540_v32  ;;  %v956_v34 = vpop.f32.mrb[5].mxu1 }
 0x39d   :  { %v543_v35 = vpop.f32.mrb[6].mxu1 }
 0x39e   :  { %v546_v36 = vmax.f32 %v541_v33, 0.0  ;;  %v957_v37 = vpop.f32.mrb[7].mxu1 }
 0x3a0   :  { %v547_v38 = vpack.c.bf16 %v546_v36, %v546_v36 }
 0x3a2   :  { %975 = vmatmul.mubr.bf16.vlgmr.msra.gmra.mrb[8].mxu0 %v547_v38 }
 0x475   :  { %v653_v42 = vpop.f32.mrb[8].mxu0 }
 0x476   :  { %v654_v43 = vadd.f32 %v835_v41, %v653_v42  ;;  %v976_v44 = vpop.f32.mrb[9].mxu0 }
 0x477   :  { %v656_v45 = vpop.f32.mrb[10].mxu0 }
 0x478   :  { %v659_v46 = vmax.f32 %v654_v43, 0.0  ;;  %v977_v47 = vpop.f32.mrb[11].mxu0 }
 0x47a   :  { %v660_v48 = vpack.c.bf16 %v659_v46, %v659_v46 }
 0x47c   :  { %995 = vmatmul.mubr.bf16.vlgmr.msra.gmra.mrb[8].mxu1 %v660_v48 }
 0x54f   :  { %v766_v49 = vpop.f32.mrb[8].mxu1 }
 0x550   :  { %v767_v50 = vadd.f32 %v844_v0, %v766_v49  ;;  %v996_v51 = vpop.f32.mrb[9].mxu1 }
 0x551   :  { %v769_v52 = vpop.f32.mrb[10].mxu1 }
 0x552   :  { %v772_v53 = vsub.f32 0.0, %v767_v50  ;;  %v997_v54 = vpop.f32.mrb[11].mxu1 }
 0x554   :  { %v773_v55 = vmul.f32 1.442695, %v772_v53 }
 0x556   :  { %1067 = vpow2.f32 %v773_v55 }
 0x560   :  { %v1068_v56 = vpop.eup %1067 }
 0x561   :  { %v775_v57 = vadd.f32 1.0, %v1068_v56 }
 0x563   :  { %1069 = vrcp.f32 %v775_v57 }
 0x56d   :  { %v1070_v58 = vpop.eup %1069 }
 0x56e   :  { %777 = vst [vmem:[%s1426_s14] sm:$0xff] %v1070_v58 }

</bundles_post_ra>
